<compile_context>
chip_gen: v7x
topology: tpu7x:2x2x1
jax: 0.10.0
libtpu: 0.0.40
codegen_flags: <defaults>
</compile_context>

<pallas_src>
import math

import jax
import jax.numpy as jnp
from jax.experimental import pallas as pl
from jax.experimental.pallas import tpu as pltpu


# ---------------------------------------------------------------------------
# Generation-aware sizing.
# ---------------------------------------------------------------------------
def _vmem_capacity_bytes() -> int:
    try:
        info = pltpu.get_tpu_info()
        cap = int(getattr(info, "vmem_capacity_bytes", 0))
        if cap > 0:
            return cap
    except Exception:
        pass
    return 64 << 20  # conservative default (v7x per-TensorCore VMEM)


_VMEM_CAP = _vmem_capacity_bytes()
# Per-stream, per-pipeline-buffer block budget (bytes).  Tensor-tensor worst case is
# 3 streams x 2 buffers = 6 live blocks, so 8 MiB blocks on 128-MiB parts (v5e/v6e) and
# 4 MiB blocks on 64-MiB parts (v7x) both leave comfortable headroom.
_BLOCK_BYTES = (8 << 20) if _VMEM_CAP >= (96 << 20) else (4 << 20)
_MIN_GRID_STEPS = 4  # keep a few grid steps so v7x can shard the axis across its 2 TCs


def _compiler_params(live_block_bytes: int) -> pltpu.CompilerParams:
    # 2x for double buffering plus slack, clamped below physical VMEM.
    needed = 2 * live_block_bytes + (2 << 20)
    limit = min(_VMEM_CAP * 9 // 10, max(needed, 6 * _BLOCK_BYTES + (2 << 20)))
    return pltpu.CompilerParams(
        dimension_semantics=("parallel",),
        vmem_limit_bytes=int(limit),
    )


# ---------------------------------------------------------------------------
# Kernels.
# ---------------------------------------------------------------------------
def _sub_kernel(x_ref, y_ref, o_ref):
    # y may carry size-1 dims; the broadcast happens on the VPU (free - VALU has huge slack).
    o_ref[...] = x_ref[...] - y_ref[...]


def _sub_scalar_kernel(y_ref, x_ref, o_ref):
    # y is a single 32-bit scalar in SMEM; cast back to x's dtype on the VPU.
    o_ref[...] = x_ref[...] - y_ref[0].astype(x_ref.dtype)


# ---------------------------------------------------------------------------
# Tiling helpers.
# ---------------------------------------------------------------------------
def _pick_lane(n: int):
    """Widest lane-dense last dim (multiple of 128) that divides n exactly (no padding)."""
    for lane in (4096, 2048, 1024, 512, 256, 128):
        if n % lane == 0:
            return lane
    return None


def _pick_tile_rows(rows: int, lane: int, itemsize: int) -> int:
    """Byte-budgeted row-tile (multiple of 8) for a (rows, lane) slab."""
    t = max(8, (_BLOCK_BYTES // (lane * itemsize)) // 8 * 8)
    if rows <= t:
        if rows >= 8 * _MIN_GRID_STEPS:
            # Split a would-be single block into ~_MIN_GRID_STEPS steps (v7x megacore).
            t = max(8, (-(-rows // _MIN_GRID_STEPS) + 7) // 8 * 8)
        else:
            return rows  # full-extent block (legal even when rows % 8 != 0)
    return min(t, rows)


def _pick_block0(rows: int, row_bytes: int, ndim: int) -> int:
    """Leading-dim block size for the generic N-D path (trailing extents stay full)."""
    b0 = max(1, _BLOCK_BYTES // max(1, row_bytes))
    if b0 >= rows:
        # A single block would idle v7x's second TensorCore; aim for a few grid steps.
        b0 = max(1, -(-rows // _MIN_GRID_STEPS))
    if ndim == 2 and b0 < rows:
        # For 2-D blocks the second-to-last dim must be a multiple of 8 unless full-extent.
        b0 = max(8, (b0 + 7) // 8 * 8)
        if b0 >= rows:
            b0 = rows
    return min(b0, rows)


# ---------------------------------------------------------------------------
# pallas_call wrappers.
# ---------------------------------------------------------------------------
def _sub_2d(xf: jax.Array, yf: jax.Array) -> jax.Array:
    rows, lane = xf.shape
    itemsize = xf.dtype.itemsize
    tr = _pick_tile_rows(rows, lane, itemsize)
    grid = (pl.cdiv(rows, tr),)  # partial edge block is masked by Pallas
    live = 3 * tr * lane * itemsize
    return pl.pallas_call(
        _sub_kernel,
        out_shape=jax.ShapeDtypeStruct((rows, lane), xf.dtype),
        grid_spec=pltpu.PrefetchScalarGridSpec(
            num_scalar_prefetch=0,
            grid=grid,
            in_specs=[
                pl.BlockSpec((tr, lane), lambda i: (i, 0)),
                pl.BlockSpec((tr, lane), lambda i: (i, 0)),
            ],
            out_specs=pl.BlockSpec((tr, lane), lambda i: (i, 0)),
        ),
        compiler_params=_compiler_params(live),
    )(xf, yf)


def _sub_2d_scalar(xf: jax.Array, y_smem: jax.Array) -> jax.Array:
    rows, lane = xf.shape
    itemsize = xf.dtype.itemsize
    tr = _pick_tile_rows(rows, lane, itemsize)
    grid = (pl.cdiv(rows, tr),)
    live = 2 * tr * lane * itemsize
    return pl.pallas_call(
        _sub_scalar_kernel,
        out_shape=jax.ShapeDtypeStruct((rows, lane), xf.dtype),
        grid_spec=pltpu.PrefetchScalarGridSpec(
            num_scalar_prefetch=0,
            grid=grid,
            in_specs=[
                pl.BlockSpec(memory_space=pltpu.MemorySpace.SMEM),  # y: (1,) 32-bit scalar
                pl.BlockSpec((tr, lane), lambda i: (i, 0)),          # x block
            ],
            out_specs=pl.BlockSpec((tr, lane), lambda i: (i, 0)),
        ),
        compiler_params=_compiler_params(live),
    )(y_smem, xf)


def _sub_bcast_nd(xc: jax.Array, yc: jax.Array) -> jax.Array:
    """Generic path: block x along dim 0 (full trailing extents); y streamed un-broadcast."""
    ndim = xc.ndim
    shape = xc.shape
    rows = shape[0]
    rest = math.prod(shape[1:]) if ndim > 1 else 1
    itemsize = xc.dtype.itemsize
    b0 = _pick_block0(rows, rest * itemsize, ndim)
    grid = (pl.cdiv(rows, b0),)
    zeros = (0,) * (ndim - 1)

    x_block = (b0,) + shape[1:]
    x_map = lambda i: (i,) + zeros

    if yc.shape[0] == rows and rows > 1:
        y_block = (b0,) + yc.shape[1:]
        y_map = lambda i: (i,) + zeros
        y_block_elems = b0 * (math.prod(yc.shape[1:]) if ndim > 1 else 1)
    else:
        y_block = yc.shape          # whole (small) y, constant block index
        y_map = lambda i: (0,) * ndim
        y_block_elems = yc.size

    live = (2 * b0 * rest + y_block_elems) * itemsize
    return pl.pallas_call(
        _sub_kernel,
        out_shape=jax.ShapeDtypeStruct(shape, xc.dtype),
        grid_spec=pltpu.PrefetchScalarGridSpec(
            num_scalar_prefetch=0,
            grid=grid,
            in_specs=[pl.BlockSpec(x_block, x_map), pl.BlockSpec(y_block, y_map)],
            out_specs=pl.BlockSpec(x_block, x_map),
        ),
        compiler_params=_compiler_params(live),
    )(xc, yc)


# ---------------------------------------------------------------------------
# Shape plumbing.
# ---------------------------------------------------------------------------
def _as_2d_plus(x: jax.Array) -> jax.Array:
    if x.ndim >= 2:
        return x
    return x.reshape((1,) * (2 - x.ndim) + x.shape)


def _expand_rank(y: jax.Array, ndim: int) -> jax.Array:
    return y.reshape((1,) * (ndim - y.ndim) + y.shape)


def _collapse_broadcast(shape_x, shape_y):
    """Merge adjacent dims with identical broadcast behaviour -> minimal-rank shapes."""
    cx, cy, kinds = [], [], []
    for sx, sy in zip(shape_x, shape_y):
        if sx == 1:
            continue  # neutral dim
        kind = "m" if sy == sx else "b"
        if kinds and kinds[-1] == kind:
            cx[-1] *= sx
            cy[-1] *= sy
        else:
            cx.append(sx)
            cy.append(sy)
            kinds.append(kind)
    return tuple(cx), tuple(cy)


def minus_y(x: jax.Array, y) -> jax.Array:
    """Forward of Minus_y: x - y (y is the module's stored constant, broadcastable to x)."""
    y = jnp.asarray(y, dtype=x.dtype)
    out_shape = jnp.broadcast_shapes(x.shape, y.shape)
    if out_shape != x.shape:
        # TODO(synk): y broadcasts x up along some dim; materialize that (rare) case once.
        x = jnp.broadcast_to(x, out_shape)
    orig_shape = x.shape
    n = x.size
    if n == 0:
        return jnp.zeros(orig_shape, x.dtype)

    # --- scalar constant: keep y in SMEM; only 2 HBM streams (read x, write out) ---
    if y.size == 1:
        if jnp.issubdtype(x.dtype, jnp.floating):
            y_s = y.astype(jnp.float32).reshape(1)
        else:
            y_s = y.astype(jnp.int32).reshape(1)
        lane = _pick_lane(n)
        if lane is not None:
            return _sub_2d_scalar(x.reshape(n // lane, lane), y_s).reshape(orig_shape)
        # Ragged element count: keep the N-D shape; no pad/slice HBM passes.
        xc = _as_2d_plus(x)
        yc = y.reshape((1,) * xc.ndim)
        return _sub_bcast_nd(xc, yc).reshape(orig_shape)

    # --- same-shape constant ---
    if y.shape == orig_shape:
        lane = _pick_lane(n)
        if lane is not None:
            return _sub_2d(
                x.reshape(n // lane, lane), y.reshape(n // lane, lane)
            ).reshape(orig_shape)
        # Ragged: block the leading dim, full trailing extents (no padding).
        # TODO(synk): a truly 1-D ragged array becomes a single full-extent block.
        xc = _as_2d_plus(x)
        yc = y.reshape(xc.shape)
        return _sub_bcast_nd(xc, yc).reshape(orig_shape)

    # --- broadcast constant (e.g. per-channel): keep y small, broadcast on the VPU ---
    ye = _expand_rank(y, x.ndim)
    cx, cy = _collapse_broadcast(orig_shape, ye.shape)
    if len(cx) < 2:
        cx = ((1,) + cx) if cx else (1, 1)
        cy = ((1,) + cy) if cy else (1, 1)
    xc = x.reshape(cx)
    yc = ye.reshape(cy)
    return _sub_bcast_nd(xc, yc).reshape(orig_shape)


if __name__ == "__main__":
    key = jax.random.PRNGKey(0)
    kx, ky, ks, kc, kr, kr2 = jax.random.split(key, 6)

    # Small NCHW-style input, consistent with the PyTorch module's generic forward.
    x = jax.random.normal(kx, (2, 4, 16, 16), dtype=jnp.float32)

    # Case 1: stored y with the same shape as x (lane-dense tensor-tensor path).
    y = jax.random.normal(ky, (2, 4, 16, 16), dtype=jnp.float32)
    out = minus_y(x, y)
    jax.block_until_ready(out)
    ref = x - y
    assert out.shape == ref.shape and out.dtype == ref.dtype
    assert jnp.max(jnp.abs(out - ref)) < 1e-6

    # Case 2: stored scalar y (kept un-broadcast, 32-bit in SMEM).
    y_s = jax.random.normal(ks, (), dtype=jnp.float32)
    out_s = minus_y(x, y_s)
    jax.block_until_ready(out_s)
    ref_s = x - y_s
    assert out_s.shape == ref_s.shape and out_s.dtype == ref_s.dtype
    assert jnp.max(jnp.abs(out_s - ref_s)) < 1e-6

    # Case 3: per-channel y (broadcast on the VPU inside the kernel, no broadcast_to).
    y_c = jax.random.normal(kc, (4, 1, 1), dtype=jnp.float32)
    out_c = minus_y(x, y_c)
    jax.block_until_ready(out_c)
    ref_c = x - y_c
    assert out_c.shape == ref_c.shape and out_c.dtype == ref_c.dtype
    assert jnp.max(jnp.abs(out_c - ref_c)) < 1e-6

    # Case 4: ragged element count (no pad/slice fallback), same-shape y.
    x_r = jax.random.normal(kr, (3, 5, 7), dtype=jnp.float32)
    y_r = jax.random.normal(kr2, (3, 5, 7), dtype=jnp.float32)
    out_r = minus_y(x_r, y_r)
    jax.block_until_ready(out_r)
    ref_r = x_r - y_r
    assert out_r.shape == ref_r.shape and out_r.dtype == ref_r.dtype
    assert jnp.max(jnp.abs(out_r - ref_r)) < 1e-6

    # Case 5: bf16 input with scalar y (exercises the 32-bit SMEM scalar fix).
    x_b = x.astype(jnp.bfloat16)
    out_b = minus_y(x_b, y_s.astype(jnp.bfloat16))
    jax.block_until_ready(out_b)
    ref_b = x_b - y_s.astype(jnp.bfloat16)
    assert out_b.shape == ref_b.shape and out_b.dtype == ref_b.dtype
    assert jnp.max(jnp.abs(out_b.astype(jnp.float32) - ref_b.astype(jnp.float32))) < 1e-2

    print("KERNEL_OK")
</pallas_src>

<mosaic_0001>
module attributes {stable_mosaic.version = 11 : i64} {
  func.func @_sub_kernel(%arg0: i32, %arg1: memref<1x2048xf32, #tpu.memory_space<vmem>>, %arg2: memref<1x2048xf32, #tpu.memory_space<vmem>>, %arg3: memref<1x2048xf32, #tpu.memory_space<vmem>>) attributes {dimension_semantics = [#tpu.dimension_semantics<parallel>], iteration_bounds = array<i64: 1>, scalar_prefetch = 0 : i64, scratch_operands = 0 : i64, tpu.core_type = #tpu.core_type<tc>, window_params = [{transform_indices = @transform_0, window_bounds = array<i64: 1, 2048>}, {transform_indices = @transform_1, window_bounds = array<i64: 1, 2048>}, {transform_indices = @transform_2, window_bounds = array<i64: 1, 2048>}]} {
    %c0 = arith.constant 0 : index
    %c0_0 = arith.constant 0 : index
    %0 = vector.load %arg1[%c0, %c0_0] : memref<1x2048xf32, #tpu.memory_space<vmem>>, vector<1x2048xf32>
    %c0_1 = arith.constant 0 : index
    %c0_2 = arith.constant 0 : index
    %1 = vector.load %arg2[%c0_1, %c0_2] : memref<1x2048xf32, #tpu.memory_space<vmem>>, vector<1x2048xf32>
    %2 = arith.subf %0, %1 : vector<1x2048xf32>
    %c0_3 = arith.constant 0 : index
    %c0_4 = arith.constant 0 : index
    %3 = vector.load %arg3[%c0_3, %c0_4] : memref<1x2048xf32, #tpu.memory_space<vmem>>, vector<1x2048xf32>
    tpu.vector_store %arg3[%c0_3, %c0_4], %2 {strides = array<i32>} : memref<1x2048xf32, #tpu.memory_space<vmem>>, vector<1x2048xf32>,
    return
  }
  func.func @transform_0(%arg0: i32) -> (i32, i32) {
    %c0_i32 = arith.constant 0 : i32
    %c0_i32_0 = arith.constant 0 : i32
    return %arg0, %c0_i32 : i32, i32
  }
  func.func @transform_1(%arg0: i32) -> (i32, i32) {
    %c0_i32 = arith.constant 0 : i32
    %c0_i32_0 = arith.constant 0 : i32
    return %arg0, %c0_i32 : i32, i32
  }
  func.func @transform_2(%arg0: i32) -> (i32, i32) {
    %c0_i32 = arith.constant 0 : i32
    %c0_i32_0 = arith.constant 0 : i32
    return %arg0, %c0_i32 : i32, i32
  }
}

</mosaic_0001>

<bundles_post_ra>
// kernel: tpu_custom_call.1
= control target key start
LH: loop header
LB: loop body
LE: loop exit
PB: predicated region body
PF: predicated region fallthrough
CT: control target
= control target key end

     0   :  { %7 = vsyncpa [#allocation3], 0  ;;  %s189_s0 = inlined_call_operand.hbm [shape: f32[1,2048], index: 0, kind: input, shape index: {}]   ;;  %s190_s1 = inlined_call_operand.hbm [shape: f32[1,2048], index: 1, kind: input, shape index: {}]   ;;  %s191_s2 = inlined_call_operand.hbm [shape: f32[1,2048], index: 2, kind: output, shape index: {}]  }
   0x1   :  { %8 = vsyncpa [#allocation6], 0 }
   0x2   :  { %9 = vsyncpa [#allocation4], 0  ;;  %s135_s9 = smov [#allocation2]   ;;  %s136_s11 = smov [#allocation5]  }
   0x3   :  { %s16_s10 = sshll.u32 %s135_s9, 4  ;;  %s26_s12 = sshll.u32 %s136_s11, 4  ;;  %s17_s10 = int_to_ptr.vmem [resolvable:$true] %s16_s10  ;;  %s27_s12 = int_to_ptr.vmem [resolvable:$true] %s26_s12 }
   0x4   :  { %s63_s15 = scalar_lea.hbm %s189_s0, 256 }
   0x5   :  { %p64_p0 = scmp.ne.s32.totalorder %s189_s0, %s63_s15  ;;  %p67_p1 = scmp.lt.u32.totalorder %s63_s15, %s189_s0 }
   0x7   :  { %p69_p2 = pnand %p67_p1, %p64_p0 }
   0x9   :  { %72 = shalt.err (!%p69_p2)
}
   0xa   :  { %s73_s20 = scalar_lea.vmem %s17_s10, 256  ;;  %p78_p4 = scmp.lt.s32.totalorder %s17_s10, %s17_s10 }
   0xb   :  { %p74_p3 = scmp.ne.s32.totalorder %s17_s10, %s73_s20  ;;  %p79_p5 = scmp.lt.s32.totalorder %s73_s20, %s73_s20 }
   0xd   :  { %p80_p6 = por %p79_p5, %p78_p4 }
   0xf   :  { %p81_p7 = pnand %p80_p6, %p74_p3 }
  0x11   :  { %84 = shalt.err (!%p81_p7)
}
  0x12   :  { %19 = dma.hbm_to_vmem [thread:$0]  %s189_s0, 256, %s17_s10, [#allocation3]  }
  0x13   :  { %s85_s25 = scalar_lea.hbm %s190_s1, 256 }
  0x14   :  { %p86_p8 = scmp.ne.s32.totalorder %s190_s1, %s85_s25  ;;  %p89_p9 = scmp.lt.u32.totalorder %s85_s25, %s190_s1 }
  0x16   :  { %p91_p10 = pnand %p89_p9, %p86_p8 }
  0x18   :  { %94 = shalt.err (!%p91_p10)
}
  0x19   :  { %s95_s30 = scalar_lea.vmem %s27_s12, 256  ;;  %p100_p12 = scmp.lt.s32.totalorder %s27_s12, %s27_s12 }
  0x1a   :  { %p96_p11 = scmp.ne.s32.totalorder %s27_s12, %s95_s30  ;;  %p101_p13 = scmp.lt.s32.totalorder %s95_s30, %s95_s30 }
  0x1c   :  { %p102_p0 = por %p101_p13, %p100_p12 }
  0x1e   :  { %p103_p1 = pnand %p102_p0, %p96_p11 }
  0x20   :  { %106 = shalt.err (!%p103_p1)
}
  0x21   :  { %29 = dma.hbm_to_vmem [thread:$0]  %s190_s1, 256, %s27_s12, [#allocation6]  }
  0x22   :  { %129 = dma.done.wait [#allocation3], 256  }
  0x23   :  { %130 = vsyncadd [#allocation3], 4294967040 }
  0x24   :  { %131 = dma.done.wait [#allocation6], 256  }
  0x25   :  { %132 = vsyncadd [#allocation6], 4294967040  ;;  %s137_s4 = smov [#allocation7]   ;;  %v36_v0 = vld [vmem:[#allocation2] sm:$0xff]  ;;  %v38_v1 = vld [vmem:[#allocation5] sm:$0xff] }
  0x26   :  { %s50_s5 = sshll.u32 %s137_s4, 4  ;;  %v37_v2 = vld [vmem:[#allocation2 + $0x8] sm:$0xff]  ;;  %v40_v3 = vsub.f32 %v36_v0, %v38_v1  ;;  %v39_v4 = vld [vmem:[#allocation5 + $0x8] sm:$0xff]  ;;  %s51_s5 = int_to_ptr.vmem [resolvable:$true] %s50_s5 }
  0x27   :  { %v41_v5 = vsub.f32 %v37_v2, %v39_v4  ;;  %s107_s6 = scalar_lea.vmem %s51_s5, 256  ;;  %p112_p3 = scmp.lt.s32.totalorder %s51_s5, %s51_s5 }
  0x28   :  { %42 = vst [vmem:[#allocation7] sm:$0xff] %v40_v3  ;;  %p108_p2 = scmp.ne.s32.totalorder %s51_s5, %s107_s6  ;;  %p113_p4 = scmp.lt.s32.totalorder %s107_s6, %s107_s6 }
  0x29   :  { %43 = vst [vmem:[#allocation7 + $0x8] sm:$0xff] %v41_v5 }
  0x2a   :  { %p114_p5 = por %p113_p4, %p112_p3 }
  0x2c   :  { %p115_p6 = pnand %p114_p5, %p108_p2 }
  0x2e   :  { %118 = shalt.err (!%p115_p6)
}
  0x2f   :  { %s119_s8 = scalar_lea.hbm %s191_s2, 256 }
  0x30   :  { %p120_p7 = scmp.ne.s32.totalorder %s191_s2, %s119_s8  ;;  %p123_p8 = scmp.lt.u32.totalorder %s119_s8, %s191_s2 }
  0x32   :  { %p125_p9 = pnand %p123_p8, %p120_p7 }
  0x34   :  { %128 = shalt.err (!%p125_p9)
}
  0x35   :  { %53 = dma.vmem_to_hbm [thread:$0]  %s51_s5, 256, %s191_s2, [#allocation4]  }
  0x36   :  { %133 = dma.done.wait [#allocation4], 256  }
  0x37   :  { %134 = vsyncadd [#allocation4], 4294967040 }
  0x38   :  { %57 = vsyncpa [#allocation3], 1 }
  0x39   :  { %58 = vsyncpa [#allocation6], 1 }
  0x3a   :  { %59 = vsyncpa [#allocation4], 1 }

</bundles_post_ra>
